<compile_context>
chip_gen: v7x
topology: tpu7x:2x2x1
jax: 0.10.0
libtpu: 0.0.40
codegen_flags: <defaults>
</compile_context>

<pallas_src>
import functools

import jax
import jax.numpy as jnp
from jax import lax
from jax.experimental import pallas as pl
from jax.experimental.pallas import tpu as pltpu


def _cdiv(a, b):
    return -(-a // b)


def _round_up(x, m):
    return ((x + m - 1) // m) * m


def _device_tuning():
    """Per-generation (feature-tile byte target, vmem limit, streaming cores)."""
    try:
        kind = jax.devices()[0].device_kind.lower()
    except Exception:
        kind = ""
    if "v7" in kind:                        # 3.2 TB/s/TC HBM, 64 MiB VMEM, 2 TCs
        return 12 << 20, 48 << 20, 2
    if "v6" in kind:                        # 1.4 TB/s, 32 MiB scoped VMEM default
        return 6 << 20, None, 1
    if "v5e" in kind or "v5 lite" in kind:  # 0.82 TB/s, 16 MiB scoped VMEM default
        return 3 << 20, None, 1
    return 4 << 20, None, 1


def _gmp_kernel(idx_ref, feat_ref, sum_ref, *, n_tiles, tail_rows):
    """Grid = (num_cores, tiles_per_core); accumulate per-batch feature sums."""
    c = pl.program_id(0)
    n = pl.program_id(1)
    tiles_per_core = pl.num_programs(1)
    tile_idx = c * tiles_per_core + n

    # Init the resident per-core accumulator at the start of each core's pass.
    @pl.when(n == 0)
    def _():
        sum_ref[...] = jnp.zeros_like(sum_ref)

    tile_n = feat_ref.shape[0]
    num_batches = sum_ref.shape[1]

    def accumulate(feat):
        # One-hot segment matrix on the lanes; padded idx columns (== -1) never
        # match any batch.  Cast the (exact) 0/1 one-hot to the feature dtype so
        # bf16 features hit the native bf16 MXU path; accumulate in f32.
        idx_row = idx_ref[0]                                            # (1, tile_n)
        batch_iota = lax.broadcasted_iota(jnp.int32, (num_batches, tile_n), 0)
        onehot = (idx_row == batch_iota).astype(feat.dtype)             # (B, tile_n)
        sum_ref[...] += jnp.dot(onehot, feat,
                                preferred_element_type=jnp.float32)[None]

    last_real = n_tiles - 1
    if tail_rows is None:
        # N is a multiple of tile_n: every real tile is full -> no mask anywhere.
        @pl.when(tile_idx <= last_real)
        def _():
            accumulate(feat_ref[...])
    else:
        # Interior tiles: unmasked fast path (no per-element mask VALU cost).
        @pl.when(tile_idx < last_real)
        def _():
            accumulate(feat_ref[...])

        # Last real (partial) tile: zero rows past the end of the point list so
        # OOB VMEM garbage (incl. NaN bit patterns) never reaches the MXU.
        @pl.when(tile_idx == last_real)
        def _():
            feat = feat_ref[...]
            row = lax.broadcasted_iota(jnp.int32, (tile_n, 1), 0)
            feat = jnp.where(row < tail_rows, feat, jnp.zeros((), feat.dtype))
            accumulate(feat)
    # tile_idx > last_real: phantom tile (re-reads the last real block); skipped.


@functools.partial(
    jax.jit,
    static_argnames=("num_batches", "tile_n", "num_cores", "vmem_limit"))
def _gmp_call(features, point_idx, *, num_batches, tile_n, num_cores, vmem_limit):
    N, C = features.shape

    n_tiles = _cdiv(N, tile_n)
    num_cores = max(1, min(int(num_cores), n_tiles))
    tiles_per_core = _cdiv(n_tiles, num_cores)
    n_chunks = num_cores * tiles_per_core            # logical tiles incl. phantoms

    # Pad ONLY the tiny int32 index array (features stream unpadded from HBM).
    idx = point_idx.astype(jnp.int32).reshape(-1)
    idx_padded = jnp.pad(idx, (0, n_chunks * tile_n - N), constant_values=-1)
    idx3d = idx_padded.reshape(n_chunks, 1, tile_n)  # lane-dense index rows

    tail = N - (n_tiles - 1) * tile_n
    tail_rows = None if tail == tile_n else tail     # static tail-mask decision

    last_block = n_tiles - 1

    def idx_map(c, n):
        return (c * tiles_per_core + n, 0, 0)

    def feat_map(c, n):
        # Phantom tiles (past the real data) re-read the last real block; the
        # kernel skips their compute entirely.
        return (jnp.minimum(c * tiles_per_core + n, last_block), 0)

    def out_map(c, n):
        return (c, 0, 0)

    cp_kwargs = dict(dimension_semantics=("parallel", "arbitrary"))
    if vmem_limit is not None:
        cp_kwargs["vmem_limit_bytes"] = int(vmem_limit)

    sums = pl.pallas_call(
        functools.partial(_gmp_kernel, n_tiles=n_tiles, tail_rows=tail_rows),
        out_shape=jax.ShapeDtypeStruct((num_cores, num_batches, C), jnp.float32),
        grid_spec=pltpu.PrefetchScalarGridSpec(
            num_scalar_prefetch=0,
            grid=(num_cores, tiles_per_core),
            in_specs=[
                pl.BlockSpec((1, 1, tile_n), idx_map),   # point_idx tile (lane-dense)
                pl.BlockSpec((tile_n, C), feat_map),     # feature tile
            ],
            # Per-core partial sums stay resident in VMEM across the whole
            # reduction axis (output block index depends only on the core axis).
            out_specs=pl.BlockSpec((1, num_batches, C), out_map),
        ),
        compiler_params=pltpu.CompilerParams(**cp_kwargs),
    )(idx3d, features)

    # Per-batch counts: tiny O(N*B) XLA reduction (matches the kernel's one-hot
    # semantics: indices < 0 or >= num_batches are dropped).
    counts = jnp.sum(
        idx[:, None] == jnp.arange(num_batches, dtype=jnp.int32)[None, :],
        axis=0).astype(jnp.float32)                      # (B,)

    # Tiny cross-core combine + single divide.  0/0 -> NaN for empty batches.
    out = sums.sum(axis=0) / counts[:, None]
    return out.astype(features.dtype)


def global_mean_pooling(features, point_idx, *, num_batches,
                        tile_n=None, num_cores=None):
    """features: (N, C); point_idx: (N,) per-point batch index -> (num_batches, C)."""
    N, C = features.shape
    itemsize = jnp.dtype(features.dtype).itemsize
    tile_bytes, vmem_limit, default_cores = _device_tuning()

    # Sub-32-bit dtypes pack along sublanes: minimum sublane tiles are
    # 8 (f32) / 16 (bf16) / 32 (int8, fp8) rows.
    sublane = {4: 8, 2: 16, 1: 32}.get(itemsize, 8)

    if tile_n is None:
        # VMEM footprint of a (tile_n, C) block: the lane dim pads to >= 128, so
        # budget with max(C, 128) per-row bytes (prevents a silent ~128/C x VMEM
        # overshoot for narrow channel counts while still streaming big tiles).
        vmem_row_bytes = max(C, 128) * itemsize
        tile_n = max(tile_bytes // vmem_row_bytes, 8 * sublane)
        # Keep the (B, tile_n) one-hot (+ int32 iota intermediate) a small
        # fraction of VMEM even for large num_batches.
        onehot_cap = max(8 * sublane, (8 << 20) // max(1, num_batches * 4))
        tile_n = min(tile_n, onehot_cap)
    tile_n = _round_up(max(int(tile_n), sublane), sublane)
    tile_n = min(tile_n, _round_up(N, sublane))          # don't exceed (rounded) N

    if num_cores is None:
        num_cores = default_cores

    return _gmp_call(features, point_idx, num_batches=int(num_batches),
                     tile_n=int(tile_n), num_cores=int(num_cores),
                     vmem_limit=vmem_limit)


def _reference(features, point_idx, num_batches):
    outs = []
    for i in range(num_batches):
        m = (point_idx == i).astype(features.dtype)
        outs.append(jnp.sum(features * m[:, None], axis=0) / jnp.sum(m))
    return jnp.stack(outs)


if __name__ == "__main__":
    key = jax.random.PRNGKey(0)
    k_feat, k_coord, k_idx = jax.random.split(key, 3)

    N, C, B = 150, 16, 3  # num sparse points, channels, batches
    features = jax.random.normal(k_feat, (N, C), dtype=jnp.float32)

    # Synthetic sparse "spatial locations": (N, 3) with last column = batch index.
    coords = jax.random.randint(k_coord, (N, 2), 0, 16)
    batch_col = jnp.concatenate(
        [jnp.arange(B, dtype=jnp.int32),                  # every batch non-empty
         jax.random.randint(k_idx, (N - B,), 0, B, dtype=jnp.int32)])
    spatial_locations = jnp.concatenate([coords, batch_col[:, None]], axis=1)

    # Glue mirroring the torch module: take the last column as the batch index.
    point_idx = spatial_locations[:, -1].astype(jnp.int32)

    ref = _reference(features, point_idx, B)

    # 1) Device-tuned defaults (single big tile / tail-mask path at this size).
    out = global_mean_pooling(features, point_idx, num_batches=B)
    out = jax.block_until_ready(out)
    assert out.shape == (B, C)
    assert jnp.allclose(out, ref, atol=1e-3, rtol=1e-3), (out, ref)

    # 2) Small tile + 2 streaming cores to exercise the multi-tile interior
    #    fast path, the gated tail mask, and phantom-tile skipping.
    out2 = global_mean_pooling(features, point_idx, num_batches=B,
                               tile_n=64, num_cores=2)
    out2 = jax.block_until_ready(out2)
    assert jnp.allclose(out2, ref, atol=1e-3, rtol=1e-3), (out2, ref)

    print("KERNEL_OK")
</pallas_src>

<mosaic_0001>
module attributes {stable_mosaic.version = 11 : i64} {
  func.func @_gmp_kernel(%arg0: i32, %arg1: i32, %arg2: memref<1x1x152xi32, #tpu.memory_space<vmem>>, %arg3: memref<152x16xf32, #tpu.memory_space<vmem>>, %arg4: memref<1x3x16xf32, #tpu.memory_space<vmem>>) attributes {dimension_semantics = [#tpu.dimension_semantics<parallel>, #tpu.dimension_semantics<arbitrary>], iteration_bounds = array<i64: 1, 1>, scalar_prefetch = 0 : i64, scratch_operands = 0 : i64, tpu.core_type = #tpu.core_type<tc>, window_params = [{transform_indices = @transform_0, window_bounds = array<i64: 1, 1, 152>}, {transform_indices = @transform_1, window_bounds = array<i64: 152, 16>}, {transform_indices = @transform_2, window_bounds = array<i64: 1, 3, 16>}]} {
    %c1_i32 = arith.constant 1 : i32
    %0 = arith.muli %arg0, %c1_i32 : i32
    %1 = arith.addi %0, %arg1 : i32
    %c0_i32 = arith.constant 0 : i32
    %2 = arith.cmpi eq, %arg1, %c0_i32 : i32
    %3 = arith.extui %2 : i1 to i32
    %c0_i32_0 = arith.constant 0 : i32
    %4 = arith.cmpi ne, %3, %c0_i32_0 : i32
    scf.if %4 {
      %cst = arith.constant 0.000000e+00 : f32
      %11 = vector.broadcast %cst : f32 to vector<1x3x16xf32>
      %c0 = arith.constant 0 : index
      %c0_5 = arith.constant 0 : index
      %c0_6 = arith.constant 0 : index
      %12 = vector.load %arg4[%c0, %c0_5, %c0_6] : memref<1x3x16xf32, #tpu.memory_space<vmem>>, vector<1x3x16xf32>
      tpu.vector_store %arg4[%c0, %c0_5, %c0_6], %11 {strides = array<i32>} : memref<1x3x16xf32, #tpu.memory_space<vmem>>, vector<1x3x16xf32>,
    } else {
    }
    %c0_i32_1 = arith.constant 0 : i32
    %5 = arith.cmpi slt, %1, %c0_i32_1 : i32
    %6 = arith.extui %5 : i1 to i32
    %c0_i32_2 = arith.constant 0 : i32
    %7 = arith.cmpi ne, %6, %c0_i32_2 : i32
    scf.if %7 {
      %c0 = arith.constant 0 : index
      %c0_5 = arith.constant 0 : index
      %11 = vector.load %arg3[%c0, %c0_5] : memref<152x16xf32, #tpu.memory_space<vmem>>, vector<152x16xf32>
      %c0_6 = arith.constant 0 : index
      %c0_7 = arith.constant 0 : index
      %c0_8 = arith.constant 0 : index
      %12 = vector.load %arg2[%c0_6, %c0_7, %c0_8] : memref<1x1x152xi32, #tpu.memory_space<vmem>>, vector<1x1x152xi32>
      %13 = vector.shape_cast %12 : vector<1x1x152xi32> to vector<1x152xi32>
      %14 = tpu.iota {dimensions = array<i32: 0>} : vector<3x152xi32>
      %15 = vector.broadcast %13 : vector<1x152xi32> to vector<3x152xi32>
      %16 = arith.cmpi eq, %15, %14 : vector<3x152xi32>
      %17 = arith.extui %16 : vector<3x152xi1> to vector<3x152xi32>
      %18 = arith.sitofp %17 : vector<3x152xi32> to vector<3x152xf32>
      %c0_9 = arith.constant 0 : index
      %c0_10 = arith.constant 0 : index
      %c0_11 = arith.constant 0 : index
      %19 = vector.load %arg4[%c0_9, %c0_10, %c0_11] : memref<1x3x16xf32, #tpu.memory_space<vmem>>, vector<1x3x16xf32>
      %cst = arith.constant dense<0.000000e+00> : vector<3x16xf32>
      %20 = tpu.matmul %18, %11, %cst {dimension_numbers = #tpu.dot_dimension_numbers<[1], [0], [0], [1], [0, 0, 1, 1], [], []>} : vector<3x152xf32>, vector<152x16xf32>, vector<3x16xf32> -> vector<3x16xf32>
      %21 = vector.shape_cast %20 : vector<3x16xf32> to vector<1x3x16xf32>
      %22 = arith.addf %19, %21 : vector<1x3x16xf32>
      %c0_12 = arith.constant 0 : index
      %c0_13 = arith.constant 0 : index
      %c0_14 = arith.constant 0 : index
      %23 = vector.load %arg4[%c0_12, %c0_13, %c0_14] : memref<1x3x16xf32, #tpu.memory_space<vmem>>, vector<1x3x16xf32>
      tpu.vector_store %arg4[%c0_12, %c0_13, %c0_14], %22 {strides = array<i32>} : memref<1x3x16xf32, #tpu.memory_space<vmem>>, vector<1x3x16xf32>,
    } else {
    }
    %c0_i32_3 = arith.constant 0 : i32
    %8 = arith.cmpi eq, %1, %c0_i32_3 : i32
    %9 = arith.extui %8 : i1 to i32
    %c0_i32_4 = arith.constant 0 : i32
    %10 = arith.cmpi ne, %9, %c0_i32_4 : i32
    scf.if %10 {
      %c0 = arith.constant 0 : index
      %c0_5 = arith.constant 0 : index
      %11 = vector.load %arg3[%c0, %c0_5] : memref<152x16xf32, #tpu.memory_space<vmem>>, vector<152x16xf32>
      %12 = tpu.iota {dimensions = array<i32: 0>} : vector<152x1xi32>
      %c150_i32 = arith.constant 150 : i32
      %13 = vector.broadcast %c150_i32 : i32 to vector<152x1xi32>
      %14 = arith.cmpi slt, %12, %13 : vector<152x1xi32>
      %cst = arith.constant 0.000000e+00 : f32
      %15 = vector.shape_cast %14 : vector<152x1xi1> to vector<152x1xi1>
      %16 = vector.broadcast %15 : vector<152x1xi1> to vector<152x16xi1>
      %17 = vector.broadcast %cst : f32 to vector<152x16xf32>
      %18 = arith.select %16, %11, %17 : vector<152x16xi1>, vector<152x16xf32>
      %c0_6 = arith.constant 0 : index
      %c0_7 = arith.constant 0 : index
      %c0_8 = arith.constant 0 : index
      %19 = vector.load %arg2[%c0_6, %c0_7, %c0_8] : memref<1x1x152xi32, #tpu.memory_space<vmem>>, vector<1x1x152xi32>
      %20 = vector.shape_cast %19 : vector<1x1x152xi32> to vector<1x152xi32>
      %21 = tpu.iota {dimensions = array<i32: 0>} : vector<3x152xi32>
      %22 = vector.broadcast %20 : vector<1x152xi32> to vector<3x152xi32>
      %23 = arith.cmpi eq, %22, %21 : vector<3x152xi32>
      %24 = arith.extui %23 : vector<3x152xi1> to vector<3x152xi32>
      %25 = arith.sitofp %24 : vector<3x152xi32> to vector<3x152xf32>
      %c0_9 = arith.constant 0 : index
      %c0_10 = arith.constant 0 : index
      %c0_11 = arith.constant 0 : index
      %26 = vector.load %arg4[%c0_9, %c0_10, %c0_11] : memref<1x3x16xf32, #tpu.memory_space<vmem>>, vector<1x3x16xf32>
      %cst_12 = arith.constant dense<0.000000e+00> : vector<3x16xf32>
      %27 = tpu.matmul %25, %18, %cst_12 {dimension_numbers = #tpu.dot_dimension_numbers<[1], [0], [0], [1], [0, 0, 1, 1], [], []>} : vector<3x152xf32>, vector<152x16xf32>, vector<3x16xf32> -> vector<3x16xf32>
      %28 = vector.shape_cast %27 : vector<3x16xf32> to vector<1x3x16xf32>
      %29 = arith.addf %26, %28 : vector<1x3x16xf32>
      %c0_13 = arith.constant 0 : index
      %c0_14 = arith.constant 0 : index
      %c0_15 = arith.constant 0 : index
      %30 = vector.load %arg4[%c0_13, %c0_14, %c0_15] : memref<1x3x16xf32, #tpu.memory_space<vmem>>, vector<1x3x16xf32>
      tpu.vector_store %arg4[%c0_13, %c0_14, %c0_15], %29 {strides = array<i32>} : memref<1x3x16xf32, #tpu.memory_space<vmem>>, vector<1x3x16xf32>,
    } else {
    }
    return
  }
  func.func @transform_0(%arg0: i32, %arg1: i32) -> (i32, i32, i32) {
    %c1_i32 = arith.constant 1 : i32
    %0 = arith.muli %arg0, %c1_i32 : i32
    %1 = arith.addi %0, %arg1 : i32
    %c0_i32 = arith.constant 0 : i32
    %c0_i32_0 = arith.constant 0 : i32
    %c0_i32_1 = arith.constant 0 : i32
    return %1, %c0_i32, %c0_i32_0 : i32, i32, i32
  }
  func.func @transform_1(%arg0: i32, %arg1: i32) -> (i32, i32) {
    %c1_i32 = arith.constant 1 : i32
    %0 = arith.muli %arg0, %c1_i32 : i32
    %1 = arith.addi %0, %arg1 : i32
    %c0_i32 = arith.constant 0 : i32
    %2 = arith.minsi %1, %c0_i32 : i32
    %c0_i32_0 = arith.constant 0 : i32
    %c0_i32_1 = arith.constant 0 : i32
    return %2, %c0_i32_0 : i32, i32
  }
  func.func @transform_2(%arg0: i32, %arg1: i32) -> (i32, i32, i32) {
    %c0_i32 = arith.constant 0 : i32
    %c0_i32_0 = arith.constant 0 : i32
    %c0_i32_1 = arith.constant 0 : i32
    return %arg0, %c0_i32, %c0_i32_0 : i32, i32, i32
  }
}

</mosaic_0001>

<bundles_post_ra>
// kernel: _gmp_call.1
= control target key start
LH: loop header
LB: loop body
LE: loop exit
PB: predicated region body
PF: predicated region fallthrough
CT: control target
= control target key end

     0   :  { %v208_v0 = vlaneseq  ;;  %v452_v1 = vmov 0.0|0.0   ;;  %vm65_vm0 = vcmask 124928   ;;  %v453_v8 = vmov 0.0   ;;  %s541_s1 = inlined_call_operand.vmem [shape: f32[150,16], index: 1, kind: input, shape index: {}]   ;;  %s542_s2 = inlined_call_operand.vmem [shape: f32[1,3,16], index: 2, kind: output, shape index: {}]   ;;  %s543_s0 = inlined_call_operand.vmem [shape: s32[1,1,152], index: 0, kind: input, shape index: {}]  }
   0x1   :  { %422 = vmatprep.subr.bf16.mxu0 %v452_v1  ;;  %v189_v2 = vld [vmem:[%s541_s1] sm:$0xff]  ;;  %v190_v3 = vld [vmem:[%s541_s1 + $0x8] sm:$0xff]  ;;  %v191_v4 = vld [vmem:[%s541_s1 + $0x10] sm:$0xff]  ;;  %66 = vst.msk [vmem:[%s542_s2] sm:$0x7] %vm65_vm0, %v453_v8  ;;  %vm320_vm1 = vcmask 195584  }
   0x2   :  { %v423_v5 = vpack.c.bf16 %v190_v3, %v189_v2  ;;  %v192_v6 = vld [vmem:[%s541_s1 + $0x18] sm:$0xff]  ;;  %v209_v7 = vshrl.u32 %v208_v0, 7  ;;  %v193_v11 = vld [vmem:[%s541_s1 + $0x20] sm:$0xff]  ;;  %v194_v12 = vld [vmem:[%s541_s1 + $0x28] sm:$0xff]  ;;  %v454_v39 = vmov 1.0  }
   0x3   :  { %v426_v9 = vpack.c.bf16 %v192_v6, %v191_v4  ;;  %v304_v13 = vld [vmem:[%s543_s0] sm:$0x3]  ;;  %v429_v14 = vpack.c.bf16 %v194_v12, %v193_v11  ;;  %v195_v16 = vld [vmem:[%s541_s1 + $0x30] sm:$0xff]  ;;  %v196_v17 = vld [vmem:[%s541_s1 + $0x38] sm:$0xff] }
   0x4   :  { %424 = vmatpush1.bf16.msra.mxu0 %v423_v5  ;;  %v311_v10 = vsub.s32 1, %v209_v7  ;;  %v432_v19 = vpack.c.bf16 %v196_v17, %v195_v16  ;;  %v197_v20 = vld [vmem:[%s541_s1 + $0x40] sm:$0xff]  ;;  %v198_v21 = vld [vmem:[%s541_s1 + $0x48] sm:$0xff]  ;;  %v199_v23 = vld [vmem:[%s541_s1 + $0x50] sm:$0xff]  ;;  %v307_v34 = vsub.s32 0, %v209_v7  ;;  %v227_v36 = vadd.s32 144, %v209_v7 }
   0x5   :  { %425 = vmatprep.subr.bf16.mxu0 %v452_v1  ;;  %v435_v22 = vpack.c.bf16 %v198_v21, %v197_v20  ;;  %v200_v24 = vld [vmem:[%s541_s1 + $0x58] sm:$0xff]  ;;  %v201_v26 = vld [vmem:[%s541_s1 + $0x60] sm:$0xff]  ;;  %v202_v27 = vld [vmem:[%s541_s1 + $0x68] sm:$0xff] }
   0x6   :  { %v312_v15 = vrot.slane %v304_v13, %v311_v10  ;;  %v438_v25 = vpack.c.bf16 %v200_v24, %v199_v23  ;;  %v441_v28 = vpack.c.bf16 %v202_v27, %v201_v26  ;;  %v203_v29 = vld [vmem:[%s541_s1 + $0x70] sm:$0xff]  ;;  %v204_v30 = vld [vmem:[%s541_s1 + $0x78] sm:$0xff]  ;;  %v205_v32 = vld [vmem:[%s541_s1 + $0x80] sm:$0xff]  ;;  %v308_v37 = vrot.slane %v304_v13, %v307_v34 }
   0x7   :  { %v444_v31 = vpack.c.bf16 %v204_v30, %v203_v29  ;;  %v206_v33 = vld [vmem:[%s541_s1 + $0x88] sm:$0xff]  ;;  %v207_v38 = vld [vmem:[%s541_s1 + $0x90] sm:$0xff]  ;;  %vm246_vm3 = vcmp.lt.s32.totalorder %v227_v36, 150 }
   0x8   :  { %427 = vmatpush1.bf16.msra.mxu0 %v426_v9  ;;  %vm314_vm2 = vcmp.eq.s32.totalorder %v312_v15, %v209_v7  ;;  %v447_v35 = vpack.c.bf16 %v206_v33, %v205_v32  ;;  %vm313_vm4 = vcmp.eq.s32.totalorder %v308_v37, %v209_v7  ;;  %v319_v40 = vld [vmem:[%s542_s2] sm:$0x7] }
   0x9   :  { %428 = vmatprep.subr.bf16.mxu0 %v452_v1  ;;  %v418_v18 = vsel %vm314_vm2, 1.0, %v453_v8 }
   0xa   :  { %420 = vmatprep.mubr.msk.f32.mxu0 %vm320_vm1, %v418_v18 }
   0xc   :  { %430 = vmatpush1.bf16.msra.mxu0 %v429_v14 }
   0xd   :  { %431 = vmatprep.subr.bf16.mxu0 %v452_v1 }
  0x10   :  { %433 = vmatpush1.bf16.msra.mxu0 %v432_v19 }
  0x11   :  { %434 = vmatprep.subr.bf16.mxu0 %v452_v1 }
  0x14   :  { %436 = vmatpush1.bf16.msra.mxu0 %v435_v22 }
  0x15   :  { %437 = vmatprep.subr.bf16.mxu0 %v452_v1 }
  0x18   :  { %439 = vmatpush1.bf16.msra.mxu0 %v438_v25 }
  0x19   :  { %440 = vmatprep.subr.bf16.mxu0 %v452_v1 }
  0x1c   :  { %442 = vmatpush1.bf16.msra.mxu0 %v441_v28 }
  0x1d   :  { %443 = vmatprep.subr.bf16.mxu0 %v452_v1 }
  0x20   :  { %445 = vmatpush1.bf16.msra.mxu0 %v444_v31 }
  0x21   :  { %446 = vmatprep.subr.bf16.mxu0 %v452_v1 }
  0x24   :  { %448 = vmatpush1.bf16.msra.mxu0 %v447_v35 }
  0x25   :  { %360 = vmatprep.subr.mxu0 %v453_v8 }
  0x28   :  { %419 = vmatpush1.msk.msra.mxu0 %vm246_vm3, %v207_v38 }
  0x29   :  { %421 = vmatmul.mubr.msk.f32.vlgmr.msra.gmra.mrb[0].mxu0 %vm313_vm4, %v454_v39 }
  0xfc   :  { %v390_v41 = vpop.f32.mrb[0].mxu0 }
  0xfd   :  { %v394_v42 = vadd.f32 %v390_v41, %v319_v40  ;;  %v392_v43 = vpop.f32.mrb[1].mxu0 }
  0xff   :  { %396 = vst.msk [vmem:[%s542_s2] sm:$0x7] %vm65_vm0, %v394_v42 }

</bundles_post_ra>
